<compile_context>
chip_gen: v7x
topology: tpu7x:2x2x1
jax: 0.10.0
libtpu: 0.0.40
codegen_flags: <defaults>
</compile_context>

<pallas_src>
import functools
import math

import jax
import jax.numpy as jnp
from jax.experimental import pallas as pl
from jax.experimental.pallas import tpu as pltpu


def _round_up(x, m):
    return -(-x // m) * m


def _style_token_kernel(
    ref_ref,            # (Bblk, Dref)        reference embeddings block
    wq_ref, bq_ref,     # (Dref, Dfeat), (1, Dfeat)   pre-scaled by 1/sqrt(d_k)
    kbd_ref,            # (Dfeat, H*Tpad)     block-diagonal per-head k^T
    mask_ref,           # (1, H*Tpad)         additive {0, -1e30} token mask
    wf_ref,             # (H*Tpad, Dfeat)     per-head fused v_h @ Wo_h
    bo_ref,             # (1, Dfeat)
    o_ref,              # (Bblk, Dfeat)
    *,
    n_heads, t_pad,
):
    f32 = jnp.float32
    x = ref_ref[...].astype(f32)                                     # (Bblk, Dref)

    # q projection (scale already folded into Wq/bq).
    q = jnp.dot(x, wq_ref[...], preferred_element_type=f32) + bq_ref[...]

    # All-head scores in one full-depth MXU pass; mask padded token lanes.
    s_all = jnp.dot(q, kbd_ref[...], preferred_element_type=f32) + mask_ref[...]

    acc = None
    for h in range(n_heads):                      # static unroll, n_heads small
        lo = h * t_pad
        s = s_all[:, lo:lo + t_pad]                                  # (Bblk, Tpad)
        s = s - jnp.max(s, axis=-1, keepdims=True)
        e = jnp.exp(s)
        inv = pl.reciprocal(jnp.sum(e, axis=-1, keepdims=True), approx=True)
        p = e * inv
        # Wo already folded into wf -> K=Tpad, N=Dfeat lane-dense accumulate.
        c = jnp.dot(p, wf_ref[lo:lo + t_pad, :], preferred_element_type=f32)
        acc = c if acc is None else acc + c

    o_ref[...] = (acc + bo_ref[...]).astype(o_ref.dtype)


def style_token_layer(ref_embs, params, *, n_heads=4, block_b=1024):
    """ref_embs: (B, ref_embed_dim) float32. Returns (B, gst_token_dim) float32."""
    B, d_ref = ref_embs.shape
    n_tokens, d_k = params["gst_embs"].shape
    d_feat = params["wq"].shape[1]
    assert d_feat == n_heads * d_k

    f32 = jnp.float32
    t_pad = _round_up(n_tokens, 8)       # sublane-friendly token padding
    st = n_heads * t_pad                 # score width (all heads)

    # ---------------- batch-independent precompute (plain XLA) ----------------
    g = jnp.tanh(params["gst_embs"].astype(f32))                     # (Ntok, d_k)
    k = g @ params["wk"].astype(f32) + params["bk"].astype(f32)      # (Ntok, Dfeat)
    v = g @ params["wv"].astype(f32) + params["bv"].astype(f32)      # (Ntok, Dfeat)
    wo = params["wo"].astype(f32)

    scale = 1.0 / math.sqrt(d_k)
    wq_s = params["wq"].astype(f32) * scale
    bq_s = (params["bq"].astype(f32) * scale).reshape(1, d_feat)
    bo = params["bo"].astype(f32).reshape(1, d_feat)

    # Block-diagonal k^T and Wo-fused value weights (padded rows/cols are zero
    # and additionally neutralized by the additive mask before softmax).
    kbd = jnp.zeros((d_feat, st), f32)
    wfused = jnp.zeros((st, d_feat), f32)
    for h in range(n_heads):
        ksl = k[:, h * d_k:(h + 1) * d_k]                            # (Ntok, d_k)
        vsl = v[:, h * d_k:(h + 1) * d_k]                            # (Ntok, d_k)
        kbd = kbd.at[h * d_k:(h + 1) * d_k,
                     h * t_pad:h * t_pad + n_tokens].set(ksl.T)
        wfused = wfused.at[h * t_pad:h * t_pad + n_tokens, :].set(
            vsl @ wo[h * d_k:(h + 1) * d_k, :])

    tok_valid = (jnp.arange(st) % t_pad) < n_tokens
    mask = jnp.where(tok_valid, 0.0, -1e30).astype(f32).reshape(1, st)

    # ---------------- batch blocking ----------------
    if B > block_b:
        bblk = block_b
    elif B >= 32:
        # at least 2 parallel blocks so both v7x TensorCores get work
        bblk = _round_up(-(-B // 2), 8)
    else:
        bblk = _round_up(B, 8)
    b_pad = _round_up(B, bblk)

    x = ref_embs
    if b_pad != B:
        x = jnp.zeros((b_pad, d_ref), ref_embs.dtype).at[:B].set(ref_embs)

    n_blocks = b_pad // bblk
    grid = (n_blocks,)

    args = (x, wq_s, bq_s, kbd, mask, wfused, bo)

    def full_spec(a):
        return pl.BlockSpec(a.shape, lambda b: (0,) * a.ndim)

    # CostEstimate: weights/mask use constant index_maps -> fetched once.
    flops = int(2 * b_pad * (d_ref * d_feat + d_feat * st + st * d_feat))
    transcendentals = int(b_pad * (st + n_heads))          # exp + reciprocal
    weight_bytes = 4 * int(wq_s.size + bq_s.size + kbd.size + mask.size
                           + wfused.size + bo.size)
    bytes_accessed = int(4 * (b_pad * d_ref + b_pad * d_feat) + weight_bytes)
    cost = pl.CostEstimate(flops=flops, transcendentals=transcendentals,
                           bytes_accessed=bytes_accessed)

    kernel = functools.partial(_style_token_kernel, n_heads=n_heads, t_pad=t_pad)
    out = pl.pallas_call(
        kernel,
        out_shape=jax.ShapeDtypeStruct((b_pad, d_feat), jnp.float32),
        grid=grid,
        in_specs=[
            pl.BlockSpec((bblk, d_ref), lambda b: (b, 0)),   # ref embeddings block
            full_spec(wq_s), full_spec(bq_s),
            full_spec(kbd), full_spec(mask),
            full_spec(wfused), full_spec(bo),
        ],
        out_specs=pl.BlockSpec((bblk, d_feat), lambda b: (b, 0)),
        compiler_params=pltpu.CompilerParams(dimension_semantics=("parallel",)),
        cost_estimate=cost,
    )(*args)
    return out[:B]


def style_token_layer_ref(ref_embs, params, *, n_heads=4):
    """Plain-JAX reference for correctness checking."""
    n_tokens, d_k = params["gst_embs"].shape
    d_feat = params["wq"].shape[1]
    B = ref_embs.shape[0]

    g = jnp.tanh(params["gst_embs"])                       # (Ntok, d_k)
    q = ref_embs @ params["wq"] + params["bq"]             # (B, Dfeat)
    k = g @ params["wk"] + params["bk"]                    # (Ntok, Dfeat)
    v = g @ params["wv"] + params["bv"]

    qh = q.reshape(B, n_heads, d_k)
    kh = k.reshape(n_tokens, n_heads, d_k)
    vh = v.reshape(n_tokens, n_heads, d_k)
    s = jnp.einsum("bhd,thd->bht", qh, kh) / jnp.sqrt(d_k)
    p = jax.nn.softmax(s, axis=-1)
    ctx = jnp.einsum("bht,thd->bhd", p, vh).reshape(B, d_feat)
    return ctx @ params["wo"] + params["bo"]


def init_params(key, ref_embed_dim=128, gst_tokens=10, gst_token_dim=256, gst_heads=4):
    d_k = gst_token_dim // gst_heads
    ks = jax.random.split(key, 9)

    def linear(kw, kb, din, dout):
        lim = 1.0 / jnp.sqrt(din)
        w = jax.random.uniform(kw, (din, dout), jnp.float32, -lim, lim)
        b = jax.random.uniform(kb, (dout,), jnp.float32, -lim, lim)
        return w, b

    wq, bq = linear(ks[0], ks[1], ref_embed_dim, gst_token_dim)
    wk, bk = linear(ks[2], ks[3], d_k, gst_token_dim)
    wv, bv = linear(ks[4], ks[5], d_k, gst_token_dim)
    wo, bo = linear(ks[6], ks[7], gst_token_dim, gst_token_dim)
    gst_embs = jax.random.normal(ks[8], (gst_tokens, d_k), jnp.float32)
    return {"gst_embs": gst_embs, "wq": wq, "bq": bq, "wk": wk, "bk": bk,
            "wv": wv, "bv": bv, "wo": wo, "bo": bo}


if __name__ == "__main__":
    # Module defaults: ref_embed_dim=128, gst_tokens=10, gst_token_dim=256, gst_heads=4
    B, D_REF, N_TOK, D_FEAT, N_HEADS = 2, 128, 10, 256, 4
    key = jax.random.PRNGKey(0)
    kx, kp = jax.random.split(key)

    ref_embs = jax.random.normal(kx, (B, D_REF), jnp.float32)
    params = init_params(kp, D_REF, N_TOK, D_FEAT, N_HEADS)

    out = style_token_layer(ref_embs, params, n_heads=N_HEADS)
    out = jax.block_until_ready(out)

    ref = style_token_layer_ref(ref_embs, params, n_heads=N_HEADS)
    assert out.shape == (B, D_FEAT)
    # Tolerance loosened slightly vs 1e-4 because the softmax denominator uses
    # the EUP approximate reciprocal (pl.reciprocal(approx=True)).
    assert jnp.allclose(out, ref, atol=2e-3, rtol=2e-3), "mismatch vs reference"
    print("KERNEL_OK")
</pallas_src>

<mosaic_0001>
module attributes {stable_mosaic.version = 11 : i64} {
  func.func @_style_token_kernel(%arg0: i32, %arg1: memref<8x128xf32, #tpu.memory_space<vmem>>, %arg2: memref<128x256xf32, #tpu.memory_space<vmem>>, %arg3: memref<1x256xf32, #tpu.memory_space<vmem>>, %arg4: memref<256x64xf32, #tpu.memory_space<vmem>>, %arg5: memref<1x64xf32, #tpu.memory_space<vmem>>, %arg6: memref<64x256xf32, #tpu.memory_space<vmem>>, %arg7: memref<1x256xf32, #tpu.memory_space<vmem>>, %arg8: memref<8x256xf32, #tpu.memory_space<vmem>>) attributes {dimension_semantics = [#tpu.dimension_semantics<parallel>], iteration_bounds = array<i64: 1>, scalar_prefetch = 0 : i64, scratch_operands = 0 : i64, tpu.core_type = #tpu.core_type<tc>, window_params = [{transform_indices = @transform_0, window_bounds = array<i64: 8, 128>}, {pipeline_mode = #tpu.pipeline_mode<synchronous>, transform_indices = @transform_1, window_bounds = array<i64: 128, 256>}, {pipeline_mode = #tpu.pipeline_mode<synchronous>, transform_indices = @transform_2, window_bounds = array<i64: 1, 256>}, {pipeline_mode = #tpu.pipeline_mode<synchronous>, transform_indices = @transform_3, window_bounds = array<i64: 256, 64>}, {pipeline_mode = #tpu.pipeline_mode<synchronous>, transform_indices = @transform_4, window_bounds = array<i64: 1, 64>}, {pipeline_mode = #tpu.pipeline_mode<synchronous>, transform_indices = @transform_5, window_bounds = array<i64: 64, 256>}, {pipeline_mode = #tpu.pipeline_mode<synchronous>, transform_indices = @transform_6, window_bounds = array<i64: 1, 256>}, {transform_indices = @transform_7, window_bounds = array<i64: 8, 256>}]} {
    %c0 = arith.constant 0 : index
    %c0_0 = arith.constant 0 : index
    %0 = vector.load %arg1[%c0, %c0_0] : memref<8x128xf32, #tpu.memory_space<vmem>>, vector<8x128xf32>
    %c0_1 = arith.constant 0 : index
    %c0_2 = arith.constant 0 : index
    %1 = vector.load %arg2[%c0_1, %c0_2] : memref<128x256xf32, #tpu.memory_space<vmem>>, vector<128x256xf32>
    %cst = arith.constant dense<0.000000e+00> : vector<8x256xf32>
    %2 = tpu.matmul %0, %1, %cst {dimension_numbers = #tpu.dot_dimension_numbers<[1], [0], [0], [1], [0, 0, 1, 1], [], []>} : vector<8x128xf32>, vector<128x256xf32>, vector<8x256xf32> -> vector<8x256xf32>
    %c0_3 = arith.constant 0 : index
    %c0_4 = arith.constant 0 : index
    %3 = vector.load %arg3[%c0_3, %c0_4] : memref<1x256xf32, #tpu.memory_space<vmem>>, vector<1x256xf32>
    %4 = vector.broadcast %3 : vector<1x256xf32> to vector<8x256xf32>
    %5 = arith.addf %2, %4 : vector<8x256xf32>
    %c0_5 = arith.constant 0 : index
    %c0_6 = arith.constant 0 : index
    %6 = vector.load %arg4[%c0_5, %c0_6] : memref<256x64xf32, #tpu.memory_space<vmem>>, vector<256x64xf32>
    %cst_7 = arith.constant dense<0.000000e+00> : vector<8x64xf32>
    %7 = tpu.matmul %5, %6, %cst_7 {dimension_numbers = #tpu.dot_dimension_numbers<[1], [0], [0], [1], [0, 0, 1, 1], [], []>} : vector<8x256xf32>, vector<256x64xf32>, vector<8x64xf32> -> vector<8x64xf32>
    %c0_8 = arith.constant 0 : index
    %c0_9 = arith.constant 0 : index
    %8 = vector.load %arg5[%c0_8, %c0_9] : memref<1x64xf32, #tpu.memory_space<vmem>>, vector<1x64xf32>
    %9 = vector.broadcast %8 : vector<1x64xf32> to vector<8x64xf32>
    %10 = arith.addf %7, %9 : vector<8x64xf32>
    %11 = vector.extract_strided_slice %10 {offsets = [0, 0], sizes = [8, 16], strides = [1, 1]} : vector<8x64xf32> to vector<8x16xf32>
    %cst_10 = arith.constant dense<0xFF800000> : vector<8xf32>
    %12 = vector.multi_reduction <maximumf>, %11, %cst_10 [1] : vector<8x16xf32> to vector<8xf32>
    %13 = vector.shape_cast %12 : vector<8xf32> to vector<8x1xf32>
    %14 = vector.broadcast %13 : vector<8x1xf32> to vector<8x16xf32>
    %15 = arith.subf %11, %14 : vector<8x16xf32>
    %16 = math.exp %15 : vector<8x16xf32>
    %cst_11 = arith.constant dense<0.000000e+00> : vector<8xf32>
    %17 = vector.multi_reduction <add>, %16, %cst_11 [1] : vector<8x16xf32> to vector<8xf32>
    %18 = vector.shape_cast %17 : vector<8xf32> to vector<8x1xf32>
    %19 = tpu.reciprocal %18 {approx = true} : vector<8x1xf32> -> vector<8x1xf32>
    %20 = vector.broadcast %19 : vector<8x1xf32> to vector<8x16xf32>
    %21 = arith.mulf %16, %20 : vector<8x16xf32>
    %c0_12 = arith.constant 0 : index
    %c0_13 = arith.constant 0 : index
    %22 = vector.load %arg6[%c0_12, %c0_13] : memref<64x256xf32, #tpu.memory_space<vmem>>, vector<16x256xf32>
    %cst_14 = arith.constant dense<0.000000e+00> : vector<8x256xf32>
    %23 = tpu.matmul %21, %22, %cst_14 {dimension_numbers = #tpu.dot_dimension_numbers<[1], [0], [0], [1], [0, 0, 1, 1], [], []>} : vector<8x16xf32>, vector<16x256xf32>, vector<8x256xf32> -> vector<8x256xf32>
    %24 = vector.extract_strided_slice %10 {offsets = [0, 16], sizes = [8, 16], strides = [1, 1]} : vector<8x64xf32> to vector<8x16xf32>
    %cst_15 = arith.constant dense<0xFF800000> : vector<8xf32>
    %25 = vector.multi_reduction <maximumf>, %24, %cst_15 [1] : vector<8x16xf32> to vector<8xf32>
    %26 = vector.shape_cast %25 : vector<8xf32> to vector<8x1xf32>
    %27 = vector.broadcast %26 : vector<8x1xf32> to vector<8x16xf32>
    %28 = arith.subf %24, %27 : vector<8x16xf32>
    %29 = math.exp %28 : vector<8x16xf32>
    %cst_16 = arith.constant dense<0.000000e+00> : vector<8xf32>
    %30 = vector.multi_reduction <add>, %29, %cst_16 [1] : vector<8x16xf32> to vector<8xf32>
    %31 = vector.shape_cast %30 : vector<8xf32> to vector<8x1xf32>
    %32 = tpu.reciprocal %31 {approx = true} : vector<8x1xf32> -> vector<8x1xf32>
    %33 = vector.broadcast %32 : vector<8x1xf32> to vector<8x16xf32>
    %34 = arith.mulf %29, %33 : vector<8x16xf32>
    %c16 = arith.constant 16 : index
    %c0_17 = arith.constant 0 : index
    %35 = vector.load %arg6[%c16, %c0_17] : memref<64x256xf32, #tpu.memory_space<vmem>>, vector<16x256xf32>
    %cst_18 = arith.constant dense<0.000000e+00> : vector<8x256xf32>
    %36 = tpu.matmul %34, %35, %cst_18 {dimension_numbers = #tpu.dot_dimension_numbers<[1], [0], [0], [1], [0, 0, 1, 1], [], []>} : vector<8x16xf32>, vector<16x256xf32>, vector<8x256xf32> -> vector<8x256xf32>
    %37 = arith.addf %23, %36 : vector<8x256xf32>
    %38 = vector.extract_strided_slice %10 {offsets = [0, 32], sizes = [8, 16], strides = [1, 1]} : vector<8x64xf32> to vector<8x16xf32>
    %cst_19 = arith.constant dense<0xFF800000> : vector<8xf32>
    %39 = vector.multi_reduction <maximumf>, %38, %cst_19 [1] : vector<8x16xf32> to vector<8xf32>
    %40 = vector.shape_cast %39 : vector<8xf32> to vector<8x1xf32>
    %41 = vector.broadcast %40 : vector<8x1xf32> to vector<8x16xf32>
    %42 = arith.subf %38, %41 : vector<8x16xf32>
    %43 = math.exp %42 : vector<8x16xf32>
    %cst_20 = arith.constant dense<0.000000e+00> : vector<8xf32>
    %44 = vector.multi_reduction <add>, %43, %cst_20 [1] : vector<8x16xf32> to vector<8xf32>
    %45 = vector.shape_cast %44 : vector<8xf32> to vector<8x1xf32>
    %46 = tpu.reciprocal %45 {approx = true} : vector<8x1xf32> -> vector<8x1xf32>
    %47 = vector.broadcast %46 : vector<8x1xf32> to vector<8x16xf32>
    %48 = arith.mulf %43, %47 : vector<8x16xf32>
    %c32 = arith.constant 32 : index
    %c0_21 = arith.constant 0 : index
    %49 = vector.load %arg6[%c32, %c0_21] : memref<64x256xf32, #tpu.memory_space<vmem>>, vector<16x256xf32>
    %cst_22 = arith.constant dense<0.000000e+00> : vector<8x256xf32>
    %50 = tpu.matmul %48, %49, %cst_22 {dimension_numbers = #tpu.dot_dimension_numbers<[1], [0], [0], [1], [0, 0, 1, 1], [], []>} : vector<8x16xf32>, vector<16x256xf32>, vector<8x256xf32> -> vector<8x256xf32>
    %51 = arith.addf %37, %50 : vector<8x256xf32>
    %52 = vector.extract_strided_slice %10 {offsets = [0, 48], sizes = [8, 16], strides = [1, 1]} : vector<8x64xf32> to vector<8x16xf32>
    %cst_23 = arith.constant dense<0xFF800000> : vector<8xf32>
    %53 = vector.multi_reduction <maximumf>, %52, %cst_23 [1] : vector<8x16xf32> to vector<8xf32>
    %54 = vector.shape_cast %53 : vector<8xf32> to vector<8x1xf32>
    %55 = vector.broadcast %54 : vector<8x1xf32> to vector<8x16xf32>
    %56 = arith.subf %52, %55 : vector<8x16xf32>
    %57 = math.exp %56 : vector<8x16xf32>
    %cst_24 = arith.constant dense<0.000000e+00> : vector<8xf32>
    %58 = vector.multi_reduction <add>, %57, %cst_24 [1] : vector<8x16xf32> to vector<8xf32>
    %59 = vector.shape_cast %58 : vector<8xf32> to vector<8x1xf32>
    %60 = tpu.reciprocal %59 {approx = true} : vector<8x1xf32> -> vector<8x1xf32>
    %61 = vector.broadcast %60 : vector<8x1xf32> to vector<8x16xf32>
    %62 = arith.mulf %57, %61 : vector<8x16xf32>
    %c48 = arith.constant 48 : index
    %c0_25 = arith.constant 0 : index
    %63 = vector.load %arg6[%c48, %c0_25] : memref<64x256xf32, #tpu.memory_space<vmem>>, vector<16x256xf32>
    %cst_26 = arith.constant dense<0.000000e+00> : vector<8x256xf32>
    %64 = tpu.matmul %62, %63, %cst_26 {dimension_numbers = #tpu.dot_dimension_numbers<[1], [0], [0], [1], [0, 0, 1, 1], [], []>} : vector<8x16xf32>, vector<16x256xf32>, vector<8x256xf32> -> vector<8x256xf32>
    %65 = arith.addf %51, %64 : vector<8x256xf32>
    %c0_27 = arith.constant 0 : index
    %c0_28 = arith.constant 0 : index
    %66 = vector.load %arg7[%c0_27, %c0_28] : memref<1x256xf32, #tpu.memory_space<vmem>>, vector<1x256xf32>
    %67 = vector.broadcast %66 : vector<1x256xf32> to vector<8x256xf32>
    %68 = arith.addf %65, %67 : vector<8x256xf32>
    %c0_29 = arith.constant 0 : index
    %c0_30 = arith.constant 0 : index
    %69 = vector.load %arg8[%c0_29, %c0_30] : memref<8x256xf32, #tpu.memory_space<vmem>>, vector<8x256xf32>
    tpu.vector_store %arg8[%c0_29, %c0_30], %68 {strides = array<i32>} : memref<8x256xf32, #tpu.memory_space<vmem>>, vector<8x256xf32>,
    return
  }
  func.func @transform_0(%arg0: i32) -> (i32, i32) {
    %c0_i32 = arith.constant 0 : i32
    %c0_i32_0 = arith.constant 0 : i32
    return %arg0, %c0_i32 : i32, i32
  }
  func.func @transform_1(%arg0: i32) -> (i32, i32) {
    %c0_i32 = arith.constant 0 : i32
    %c0_i32_0 = arith.constant 0 : i32
    %c0_i32_1 = arith.constant 0 : i32
    return %c0_i32, %c0_i32_0 : i32, i32
  }
  func.func @transform_2(%arg0: i32) -> (i32, i32) {
    %c0_i32 = arith.constant 0 : i32
    %c0_i32_0 = arith.constant 0 : i32
    %c0_i32_1 = arith.constant 0 : i32
    return %c0_i32, %c0_i32_0 : i32, i32
  }
  func.func @transform_3(%arg0: i32) -> (i32, i32) {
    %c0_i32 = arith.constant 0 : i32
    %c0_i32_0 = arith.constant 0 : i32
    %c0_i32_1 = arith.constant 0 : i32
    return %c0_i32, %c0_i32_0 : i32, i32
  }
  func.func @transform_4(%arg0: i32) -> (i32, i32) {
    %c0_i32 = arith.constant 0 : i32
    %c0_i32_0 = arith.constant 0 : i32
    %c0_i32_1 = arith.constant 0 : i32
    return %c0_i32, %c0_i32_0 : i32, i32
  }
  func.func @transform_5(%arg0: i32) -> (i32, i32) {
    %c0_i32 = arith.constant 0 : i32
    %c0_i32_0 = arith.constant 0 : i32
    %c0_i32_1 = arith.constant 0 : i32
    return %c0_i32, %c0_i32_0 : i32, i32
  }
  func.func @transform_6(%arg0: i32) -> (i32, i32) {
    %c0_i32 = arith.constant 0 : i32
    %c0_i32_0 = arith.constant 0 : i32
    %c0_i32_1 = arith.constant 0 : i32
    return %c0_i32, %c0_i32_0 : i32, i32
  }
  func.func @transform_7(%arg0: i32) -> (i32, i32) {
    %c0_i32 = arith.constant 0 : i32
    %c0_i32_0 = arith.constant 0 : i32
    return %arg0, %c0_i32 : i32, i32
  }
}

</mosaic_0001>

<bundles_post_ra>
// kernel: tpu_custom_call.1
= control target key start
LH: loop header
LB: loop body
LE: loop exit
PB: predicated region body
PF: predicated region fallthrough
CT: control target
= control target key end

     0   :  { %12 = vsyncpa [#allocation3], 0  ;;  %s1224_s0 = inlined_call_operand.hbm [shape: f32[8,128], index: 0, kind: input, shape index: {}]   ;;  %s1225_s1 = inlined_call_operand.vmem [shape: f32[128,256], index: 1, kind: input, shape index: {}]   ;;  %s1226_s2 = inlined_call_operand.vmem [shape: f32[1,256], index: 2, kind: input, shape index: {}]   ;;  %s1227_s3 = inlined_call_operand.vmem [shape: f32[256,64], index: 3, kind: input, shape index: {}]   ;;  %s1228_s4 = inlined_call_operand.vmem [shape: f32[1,64], index: 4, kind: input, shape index: {}]   ;;  %s1229_s5 = inlined_call_operand.vmem [shape: f32[64,256], index: 5, kind: input, shape index: {}]   ;;  %s1230_s6 = inlined_call_operand.vmem [shape: f32[1,256], index: 6, kind: input, shape index: {}]   ;;  %s1231_s7 = inlined_call_operand.hbm [shape: f32[8,256], index: 7, kind: output, shape index: {}]  }
   0x1   :  { %13 = vsyncpa [#allocation4], 0  ;;  %s873_s24 = smov [#allocation2]   ;;  %s825_s28 = scalar_lea.hbm %s1224_s0, 128 }
   0x2   :  { %s20_s25 = sshll.u32 %s873_s24, 4  ;;  %p826_p0 = scmp.ne.s32.totalorder %s1224_s0, %s825_s28  ;;  %s21_s25 = int_to_ptr.vmem [resolvable:$true] %s20_s25 }
   0x3   :  { %p829_p1 = scmp.lt.u32.totalorder %s825_s28, %s1224_s0 }
   0x5   :  { %p831_p2 = pnand %p829_p1, %p826_p0 }
   0x7   :  { %834 = shalt.err (!%p831_p2)
}
   0x8   :  { %s835_s10 = scalar_lea.vmem %s21_s25, 128  ;;  %p840_p4 = scmp.lt.s32.totalorder %s21_s25, %s21_s25 }
   0x9   :  { %p836_p3 = scmp.ne.s32.totalorder %s21_s25, %s835_s10  ;;  %p841_p5 = scmp.lt.s32.totalorder %s835_s10, %s835_s10 }
   0xb   :  { %p842_p6 = por %p841_p5, %p840_p4 }
   0xd   :  { %p843_p7 = pnand %p842_p6, %p836_p3 }
   0xf   :  { %846 = shalt.err (!%p843_p7)
}
  0x10   :  { %23 = dma.hbm_to_vmem [thread:$0]  %s1224_s0, 128, %s21_s25, [#allocation3]  }
  0x11   :  { %869 = dma.done.wait [#allocation3], 128  }
  0x12   :  { %870 = vsyncadd [#allocation3], 4294967168  ;;  %v874_v0 = vmov 0.0   ;;  %v41_v1 = vld [vmem:[%s1225_s1 + $0x8] sm:$0xff]  ;;  %v43_v2 = vld [vmem:[%s1225_s1 + $0x18] sm:$0xff]  ;;  %vm548_vm0 = vcmask 523648  }
  0x13   :  { %148 = vmatprep.mubr.f32.mxu0 %v874_v0  ;;  %v40_v3 = vld [vmem:[%s1225_s1] sm:$0xff]  ;;  %v717_v4 = vpack.c.bf16 %v43_v2, %v41_v1  ;;  %v42_v5 = vld [vmem:[%s1225_s1 + $0x10] sm:$0xff]  ;;  %v45_v6 = vld [vmem:[%s1225_s1 + $0x28] sm:$0xff]  ;;  %vm280_vm1 = vcmask 261248   ;;  %vm450_vm2 = vcmask 392448   ;;  %s877_s22 = smov 80  }
  0x14   :  { %v47_v7 = vld [vmem:[%s1225_s1 + $0x38] sm:$0xff]  ;;  %v719_v8 = vpack.c.bf16 %v42_v5, %v40_v3  ;;  %v44_v10 = vld [vmem:[%s1225_s1 + $0x20] sm:$0xff]  ;;  %v46_v11 = vld [vmem:[%s1225_s1 + $0x30] sm:$0xff]  ;;  %vm264_vm3 = vcmask 130048  }
  0x15   :  { %v721_v9 = vpack.c.bf16 %v47_v7, %v45_v6  ;;  %v49_v12 = vld [vmem:[%s1225_s1 + $0x48] sm:$0xff]  ;;  %718 = vmatprep.subr.bf16.mxu0 %v717_v4  ;;  %v51_v13 = vld [vmem:[%s1225_s1 + $0x58] sm:$0xff]  ;;  %v723_v14 = vpack.c.bf16 %v46_v11, %v44_v10  ;;  %v48_v16 = vld [vmem:[%s1225_s1 + $0x40] sm:$0xff] }
  0x16   :  { %720 = vmatpush1.bf16.msra.mxu0 %v719_v8  ;;  %v725_v15 = vpack.c.bf16 %v51_v13, %v49_v12  ;;  %v50_v17 = vld [vmem:[%s1225_s1 + $0x50] sm:$0xff]  ;;  %v53_v18 = vld [vmem:[%s1225_s1 + $0x68] sm:$0xff]  ;;  %v55_v19 = vld [vmem:[%s1225_s1 + $0x78] sm:$0xff] }
  0x17   :  { %722 = vmatprep.subr.bf16.mxu0 %v721_v9  ;;  %v727_v20 = vpack.c.bf16 %v50_v17, %v48_v16  ;;  %v729_v21 = vpack.c.bf16 %v55_v19, %v53_v18  ;;  %v52_v22 = vld [vmem:[%s1225_s1 + $0x60] sm:$0xff]  ;;  %v54_v23 = vld [vmem:[%s1225_s1 + $0x70] sm:$0xff]  ;;  %v57_v24 = vld [vmem:[%s1225_s1 + $0x88] sm:$0xff] }
  0x18   :  { %v59_v25 = vld [vmem:[%s1225_s1 + $0x98] sm:$0xff]  ;;  %v56_v26 = vld [vmem:[%s1225_s1 + $0x80] sm:$0xff]  ;;  %v58_v27 = vld [vmem:[%s1225_s1 + $0x90] sm:$0xff]  ;;  %v731_v31 = vpack.c.bf16 %v54_v23, %v52_v22 }
  0x19   :  { %v171_v28 = vld [vmem:[%s1227_s3 + $0x80] sm:$0xff]  ;;  %v172_v29 = vld [vmem:[%s1227_s3 + $0x88] sm:$0xff]  ;;  %v173_v34 = vld [vmem:[%s1227_s3 + $0x90] sm:$0xff]  ;;  %v733_v36 = vpack.c.bf16 %v59_v25, %v57_v24  ;;  %v735_v46 = vpack.c.bf16 %v58_v27, %v56_v26 }
  0x1a   :  { %724 = vmatpush1.bf16.msra.mxu0 %v723_v14  ;;  %v155_v30 = vld [vmem:[%s1227_s3] sm:$0xff]  ;;  %v749_v32 = vpack.c.bf16 %v172_v29, %v171_v28  ;;  %v156_v33 = vld [vmem:[%s1227_s3 + $0x8] sm:$0xff]  ;;  %v174_v35 = vld [vmem:[%s1227_s3 + $0x98] sm:$0xff] }
  0x1b   :  { %726 = vmatprep.subr.bf16.mxu0 %v725_v15  ;;  %v751_v37 = vpack.c.bf16 %v156_v33, %v155_v30  ;;  %v753_v38 = vpack.c.bf16 %v174_v35, %v173_v34  ;;  %v157_v39 = vld [vmem:[%s1227_s3 + $0x10] sm:$0xff]  ;;  %v158_v40 = vld [vmem:[%s1227_s3 + $0x18] sm:$0xff]  ;;  %v175_v41 = vld [vmem:[%s1227_s3 + $0xa0] sm:$0xff]  ;;  %v74_v35 = vlaneseq }
  0x1c   :  { %v61_v42 = vld [vmem:[%s1225_s1 + $0xa8] sm:$0xff]  ;;  %v63_v43 = vld [vmem:[%s1225_s1 + $0xb8] sm:$0xff]  ;;  %750 = vmatprep.subr.bf16.mxu1 %v749_v32  ;;  %v755_v45 = vpack.c.bf16 %v158_v40, %v157_v39  ;;  %v60_v47 = vld [vmem:[%s1225_s1 + $0xa0] sm:$0xff] }
  0x1d   :  { %v176_v44 = vld [vmem:[%s1227_s3 + $0xa8] sm:$0xff]  ;;  %752 = vmatpush3.bf16.msra.mxu1 %v751_v37  ;;  %v159_v49 = vld [vmem:[%s1227_s3 + $0x20] sm:$0xff]  ;;  %v737_v51 = vpack.c.bf16 %v63_v43, %v61_v42  ;;  %v62_v52 = vld [vmem:[%s1225_s1 + $0xb0] sm:$0xff] }
  0x1e   :  { %728 = vmatpush1.bf16.msra.mxu0 %v727_v20  ;;  %754 = vmatprep.subr.bf16.mxu1 %v753_v38  ;;  %v757_v48 = vpack.c.bf16 %v176_v44, %v175_v41  ;;  %v160_v50 = vld [vmem:[%s1227_s3 + $0x28] sm:$0xff]  ;;  %v177_v53 = vld [vmem:[%s1227_s3 + $0xb0] sm:$0xff]  ;;  %v178_v54 = vld [vmem:[%s1227_s3 + $0xb8] sm:$0xff]  ;;  %v739_v58 = vpack.c.bf16 %v62_v52, %v60_v47 }
  0x1f   :  { %730 = vmatprep.subr.bf16.mxu0 %v729_v21  ;;  %v65_v55 = vld [vmem:[%s1225_s1 + $0xc8] sm:$0xff]  ;;  %v67_v56 = vld [vmem:[%s1225_s1 + $0xd8] sm:$0xff]  ;;  %v759_v57 = vpack.c.bf16 %v160_v50, %v159_v49  ;;  %v64_v59 = vld [vmem:[%s1225_s1 + $0xc0] sm:$0xff]  ;;  %v761_v60 = vpack.c.bf16 %v178_v54, %v177_v53 }
  0x20   :  { %v161_v61 = vld [vmem:[%s1227_s3 + $0x30] sm:$0xff]  ;;  %v162_v62 = vld [vmem:[%s1227_s3 + $0x38] sm:$0xff]  ;;  %v741_v63 = vpack.c.bf16 %v67_v56, %v65_v55  ;;  %v179_v2 = vld [vmem:[%s1227_s3 + $0xc0] sm:$0xff] }
  0x21   :  { %756 = vmatpush3.bf16.msra.mxu1 %v755_v45  ;;  %v66_v1 = vld [vmem:[%s1225_s1 + $0xd0] sm:$0xff]  ;;  %v180_v3 = vld [vmem:[%s1227_s3 + $0xc8] sm:$0xff]  ;;  %v71_v5 = vld [vmem:[%s1225_s1 + $0xf8] sm:$0xff]  ;;  %v763_v6 = vpack.c.bf16 %v162_v62, %v161_v61 }
  0x22   :  { %732 = vmatpush1.bf16.msra.mxu0 %v731_v31  ;;  %758 = vmatprep.subr.bf16.mxu1 %v757_v48  ;;  %v69_v4 = vld [vmem:[%s1225_s1 + $0xe8] sm:$0xff]  ;;  %v743_v7 = vpack.c.bf16 %v66_v1, %v64_v59  ;;  %v68_v8 = vld [vmem:[%s1225_s1 + $0xe0] sm:$0xff]  ;;  %v765_v9 = vpack.c.bf16 %v180_v3, %v179_v2  ;;  %v70_v13 = vld [vmem:[%s1225_s1 + $0xf0] sm:$0xff] }
  0x23   :  { %734 = vmatprep.subr.bf16.mxu0 %v733_v36  ;;  %v163_v10 = vld [vmem:[%s1227_s3 + $0x40] sm:$0xff]  ;;  %v164_v11 = vld [vmem:[%s1227_s3 + $0x48] sm:$0xff]  ;;  %v745_v12 = vpack.c.bf16 %v71_v5, %v69_v4  ;;  %v181_v14 = vld [vmem:[%s1227_s3 + $0xd0] sm:$0xff]  ;;  %v747_v17 = vpack.c.bf16 %v70_v13, %v68_v8  ;;  %v1125_v36 = vshrl.u32 %v74_v35, 7 }
  0x24   :  { %v182_v15 = vld [vmem:[%s1227_s3 + $0xd8] sm:$0xff]  ;;  %v767_v16 = vpack.c.bf16 %v164_v11, %v163_v10  ;;  %v165_v19 = vld [vmem:[%s1227_s3 + $0x50] sm:$0xff]  ;;  %v183_v21 = vld [vmem:[%s1227_s3 + $0xe0] sm:$0xff] }
  0x25   :  { %760 = vmatpush3.bf16.msra.mxu1 %v759_v57  ;;  %v769_v18 = vpack.c.bf16 %v182_v15, %v181_v14  ;;  %v166_v20 = vld [vmem:[%s1227_s3 + $0x58] sm:$0xff]  ;;  %v184_v22 = vld [vmem:[%s1227_s3 + $0xe8] sm:$0xff]  ;;  %v39_v24 = vld [vmem:[#allocation2] sm:$0xff]  ;;  %v80_v37 = vsub.s32 1, %v1125_v36  ;;  %v76_v39 = vsub.s32 0, %v1125_v36 }
  0x26   :  { %736 = vmatpush1.bf16.msra.mxu0 %v735_v46  ;;  %762 = vmatprep.subr.bf16.mxu1 %v761_v60  ;;  %v771_v23 = vpack.c.bf16 %v166_v20, %v165_v19  ;;  %v773_v25 = vpack.c.bf16 %v184_v22, %v183_v21  ;;  %v167_v26 = vld [vmem:[%s1227_s3 + $0x60] sm:$0xff]  ;;  %v168_v27 = vld [vmem:[%s1227_s3 + $0x68] sm:$0xff]  ;;  %v185_v29 = vld [vmem:[%s1227_s3 + $0xf0] sm:$0xff] }
  0x27   :  { %738 = vmatprep.subr.bf16.mxu0 %v737_v51  ;;  %v775_v28 = vpack.c.bf16 %v168_v27, %v167_v26  ;;  %v186_v30 = vld [vmem:[%s1227_s3 + $0xf8] sm:$0xff]  ;;  %v169_v32 = vld [vmem:[%s1227_s3 + $0x70] sm:$0xff]  ;;  %v72_v38 = vld [vmem:[%s1226_s2] sm:$0x3]  ;;  %s875_s2 = smov 112  }
  0x28   :  { %v777_v31 = vpack.c.bf16 %v186_v30, %v185_v29  ;;  %v170_v33 = vld [vmem:[%s1227_s3 + $0x78] sm:$0xff]  ;;  %v81_v40 = vrot.slane %v72_v38, %v80_v37  ;;  %v77_v41 = vrot.slane %v72_v38, %v76_v39  ;;  %v677_v47 = vld [vmem:[%s1228_s4] ss:$0 sm:$0xff]  ;;  %s876_s4 = smov 96   ;;  %v297_v15 = vld [vmem:[%s1229_s5 + $0x28] sm:$0xff] }
  0x29   :  { %764 = vmatpush3.bf16.msra.mxu1 %v763_v6  ;;  %v779_v34 = vpack.c.bf16 %v170_v33, %v169_v32  ;;  %v298_v19 = vld [vmem:[%s1229_s5 + $0x30] sm:$0xff]  ;;  %v467_v20 = vld [vmem:[%s1229_s5 + $0x48] sm:$0xff]  ;;  %v469_v21 = vld [vmem:[%s1229_s5 + $0x58] sm:$0xff] }
  0x2a   :  { %740 = vmatpush1.bf16.msra.mxu0 %v739_v58  ;;  %766 = vmatprep.subr.bf16.mxu1 %v765_v9  ;;  %v468_v26 = vld [vmem:[%s1229_s5 + $0x50] sm:$0xff]  ;;  %v279_v29 = vld [vmem:[%s1229_s5 + $0x18] sm:$0xff]  ;;  %v565_v30 = vld [vmem:[%s1229_s5 + $0x68] sm:$0xff] }
  0x2b   :  { %742 = vmatprep.subr.bf16.mxu0 %v741_v63  ;;  %v567_v32 = vld [vmem:[%s1229_s5 + $0x78] sm:$0xff] }
  0x2c   :  { %v793_v33 = vpack.c.bf16 %v567_v32, %v565_v30 }
  0x2d   :  { %768 = vmatpush3.bf16.msra.mxu1 %v767_v16  ;;  %v299_v16 = vld [vmem:[%s1229_s5 + $0x38] sm:$0xff] }
  0x2e   :  { %744 = vmatpush1.bf16.msra.mxu0 %v743_v7  ;;  %770 = vmatprep.subr.bf16.mxu1 %v769_v18  ;;  %v781_v18 = vpack.c.bf16 %v299_v16, %v297_v15 }
  0x2f   :  { %746 = vmatprep.subr.bf16.mxu0 %v745_v12 }
  0x31   :  { %772 = vmatpush3.bf16.msra.mxu1 %v771_v23  ;;  %v789_v23 = vpack.c.bf16 %v469_v21, %v467_v20 }
  0x32   :  { %748 = vmatpush1.bf16.msra.mxu0 %v747_v17  ;;  %774 = vmatprep.subr.bf16.mxu1 %v773_v25  ;;  %v296_v17 = vld [vmem:[%s1229_s5 + $0x20] sm:$0xff] }
  0x33   :  { %v783_v22 = vpack.c.bf16 %v298_v19, %v296_v17  ;;  %790 = vmatprep.subr.bf16.mxu0 %v789_v23  ;;  %v466_v25 = vld [vmem:[%s1229_s5 + $0x40] sm:$0xff] }
  0x34   :  { %v791_v27 = vpack.c.bf16 %v468_v26, %v466_v25 }
  0x35   :  { %149 = vmatmul.mubr.f32.vlgmr.msra.gmra.mrb[0].mxu0 %v39_v24  ;;  %776 = vmatpush3.bf16.msra.mxu1 %v775_v28  ;;  %v277_v28 = vld [vmem:[%s1229_s5 + $0x8] sm:$0xff] }
  0x36   :  { %539 = vmatprep.mubr.f32.mxu0 %v874_v0  ;;  %778 = vmatprep.subr.bf16.mxu1 %v777_v31  ;;  %v785_v31 = vpack.c.bf16 %v279_v29, %v277_v28 }
  0x37   :  { %792 = vmatpush1.bf16.msra.mxu0 %v791_v27 }
  0x38   :  { %794 = vmatprep.subr.bf16.mxu0 %v793_v33 }
  0x39   :  { %780 = vmatpush3.bf16.msra.mxu1 %v779_v34 }
  0x3a   :  { %782 = vmatprep.subr.bf16.mxu1 %v781_v18 }
 0x108   :  { %v150_v42 = vpop.f32.mrb[0].mxu0 }
 0x109   :  { %v152_v43 = vpop.f32.mrb[1].mxu0  ;;  %v151_v45 = vadd.f32 %v150_v42, %v77_v41 }
 0x10a   :  { %v153_v44 = vadd.f32 %v152_v43, %v81_v40 }
 0x10c   :  { %258 = vmatprep.mubr.f32.mxu1 %v153_v44 }
 0x10d   :  { %259 = vmatmul.mubr.f32.vlgmr.msra.gmra.mrb[0].mxu1 %v151_v45 }
 0x10e   :  { %369 = vmatprep.mubr.f32.mxu1 %v874_v0  ;;  %784 = vmatpush1.bf16.msra.mxu1 %v783_v22 }
 0x10f   :  { %786 = vmatprep.subr.bf16.mxu1 %v785_v31 }
 0x1e0   :  { %v714_v46 = vpop.f32.mrb[0].mxu1 }
 0x1e1   :  { %v715_v48 = vpop.f32.mrb[1].mxu1 }
 0x1e2   :  { %v716_v49 = vadd.f32 %v715_v48, %v714_v46  ;;  %v276_v46 = vld [vmem:[%s1229_s5] sm:$0xff] }
 0x1e4   :  { %v261_v50 = vadd.f32 %v716_v49, %v677_v47  ;;  %v278_v47 = vld [vmem:[%s1229_s5 + $0x10] sm:$0xff]  ;;  %v564_v49 = vld [vmem:[%s1229_s5 + $0x60] sm:$0xff] }
 0x1e5   :  { %v787_v48 = vpack.c.bf16 %v278_v47, %v276_v46 }
 0x1e6   :  { %v549_v51 = vsel %vm548_vm0, %v261_v50, -inf  ;;  %v281_v52 = vsel %vm280_vm1, %v261_v50, -inf  ;;  %v451_v53 = vsel %vm450_vm2, %v261_v50, -inf  ;;  %v265_v3 = vsel %vm264_vm3, %v261_v50, -inf }
 0x1e7   :  { %550 = vmax.xlane.f32.xlu1 %v549_v51  ;;  %282 = vmax.xlane.f32.xlu0 %v281_v52 }
 0x1eb   :  { %452 = vmax.xlane.f32.xlu0 %v451_v53 }
 0x274   :  { %v551_v54 = vpop.xlane.xlu1 %550  ;;  %v283_v55 = vpop.xlane.xlu0 %282 }
 0x275   :  { %v284_v56 = vsub.f32 %v261_v50, %v283_v55  ;;  %v552_v57 = vsub.f32 %v261_v50, %v551_v54 }
 0x277   :  { %v285_v58 = vmul.f32 1.442695, %v284_v56  ;;  %v553_v61 = vmul.f32 1.442695, %v552_v57 }
 0x278   :  { %v453_v59 = vpop.xlane.xlu0 %452 }
 0x279   :  { %v454_v60 = vsub.f32 %v261_v50, %v453_v59  ;;  %809 = vpow2.f32 %v285_v58  ;;  %v646_v58 = vld [vmem:[%s1230_s6] sm:$0x3] }
 0x27b   :  { %v455_v62 = vmul.f32 1.442695, %v454_v60  ;;  %v651_v60 = vrot.slane %v646_v58, %v76_v39 }
 0x27d   :  { %811 = vpow2.f32 %v455_v62  ;;  %v655_v62 = vrot.slane %v646_v58, %v80_v37 }
 0x27e   :  { %813 = vpow2.f32 %v553_v61 }
 0x283   :  { %v810_v63 = vpop.eup %809 }
 0x284   :  { %288 = vrot.lane.b32.xlu1 %v810_v63, %s875_s2 }
 0x287   :  { %v812_v1 = vpop.eup %811 }
 0x288   :  { %v814_v2 = vpop.eup %813  ;;  %458 = vrot.lane.b32.xlu0 %v812_v1, %s876_s4 }
 0x289   :  { %556 = vrot.lane.b32.xlu1 %v814_v2, %s877_s22 }
 0x2ad   :  { %266 = vmax.xlane.f32.xlu1 %v265_v3 }
 0x2f6   :  { %v289_v4 = vpop.permute.xlu1 %288 }
 0x2f7   :  { %v291_v5 = vsel %vm264_vm3, %v289_v4, 0.0 }
 0x2f8   :  { %292 = vadd.xlane.f32.xlu0 %v291_v5 }
 0x2fa   :  { %v459_v6 = vpop.permute.xlu0 %458 }
 0x2fb   :  { %v557_v7 = vpop.permute.xlu1 %556  ;;  %v461_v8 = vsel %vm264_vm3, %v459_v6, 0.0 }
 0x2fc   :  { %v559_v9 = vsel %vm264_vm3, %v557_v7, 0.0  ;;  %462 = vadd.xlane.f32.xlu0 %v461_v8 }
 0x2fd   :  { %560 = vadd.xlane.f32.xlu1 %v559_v9 }
 0x33a   :  { %v267_v10 = vpop.xlane.xlu1 %266 }
 0x33b   :  { %v268_v11 = vsub.f32 %v261_v50, %v267_v10  ;;  %v566_v50 = vld [vmem:[%s1229_s5 + $0x70] sm:$0xff] }
 0x33c   :  { %v795_v52 = vpack.c.bf16 %v566_v50, %v564_v49 }
 0x33d   :  { %v269_v12 = vmul.f32 1.442695, %v268_v11 }
 0x33f   :  { %815 = vpow2.f32 %v269_v12 }
 0x349   :  { %v816_v13 = vpop.eup %815 }
 0x34a   :  { %v271_v14 = vsel %vm264_vm3, %v816_v13, 0.0 }
 0x34b   :  { %272 = vadd.xlane.f32.xlu0 %v271_v14 }
 0x385   :  { %v293_v24 = vpop.xlane.xlu0 %292 }
 0x386   :  { %817 = vrcp.f32 %v293_v24 }
 0x389   :  { %v463_v34 = vpop.xlane.xlu0 %462 }
 0x38a   :  { %v561_v35 = vpop.xlane.xlu1 %560  ;;  %819 = vrcp.f32 %v463_v34 }
 0x38b   :  { %821 = vrcp.f32 %v561_v35 }
 0x390   :  { %v818_v38 = vpop.eup %817 }
 0x391   :  { %v295_v40 = vmul.f32 %v818_v38, %v810_v63 }
 0x393   :  { %301 = vrot.lane.b32.xlu1 %v295_v40, %s875_s2 }
 0x394   :  { %v820_v41 = vpop.eup %819 }
 0x395   :  { %v822_v42 = vpop.eup %821  ;;  %v465_v43 = vmul.f32 %v820_v41, %v812_v1 }
 0x396   :  { %v563_v44 = vmul.f32 %v822_v42, %v814_v2 }
 0x397   :  { %471 = vrot.lane.b32.xlu0 %v465_v43, %s876_s4 }
 0x398   :  { %569 = vrot.lane.b32.xlu1 %v563_v44, %s877_s22  ;;  %s878_s22 = smov [#allocation5]  }
 0x399   :  { %s668_s28 = sshll.u32 %s878_s22, 4  ;;  %s669_s28 = int_to_ptr.vmem [resolvable:$true] %s668_s28 }
 0x39a   :  { %s847_s29 = scalar_lea.vmem %s669_s28, 256  ;;  %p852_p9 = scmp.lt.s32.totalorder %s669_s28, %s669_s28 }
 0x39b   :  { %p848_p8 = scmp.ne.s32.totalorder %s669_s28, %s847_s29  ;;  %p853_p10 = scmp.lt.s32.totalorder %s847_s29, %s847_s29 }
 0x39d   :  { %p854_p11 = por %p853_p10, %p852_p9 }
 0x39f   :  { %p855_p12 = pnand %p854_p11, %p848_p8 }
 0x3d8   :  { %v273_v45 = vpop.xlane.xlu0 %272 }
 0x3d9   :  { %823 = vrcp.f32 %v273_v45 }
 0x3e3   :  { %v824_v53 = vpop.eup %823 }
 0x3e4   :  { %v275_v55 = vmul.f32 %v824_v53, %v816_v13 }
 0x405   :  { %v302_v51 = vpop.permute.xlu1 %301 }
 0x406   :  { %678 = vmatmul.mubr.msk.f32.vlgmr.msra.gmra.mrb[2].mxu1 %vm264_vm3, %v302_v51 }
 0x407   :  { %788 = vmatpush1.bf16.msra.mxu1 %v787_v48  ;;  %443 = vmatprep.mubr.f32.mxu1 %v874_v0 }
 0x409   :  { %v472_v54 = vpop.permute.xlu0 %471 }
 0x40a   :  { %680 = vmatmul.mubr.msk.f32.vlgmr.msra.gmra.mrb[2].mxu0 %vm264_vm3, %v472_v54  ;;  %v570_v56 = vpop.permute.xlu1 %569 }
 0x40b   :  { %796 = vmatpush1.bf16.msra.mxu0 %v795_v52  ;;  %637 = vmatprep.mubr.f32.mxu0 %v874_v0 }
 0x40e   :  { %679 = vmatmul.mubr.msk.f32.vlgmr.msra.gmra.mrb[2].mxu1 %vm264_vm3, %v275_v55 }
 0x412   :  { %681 = vmatmul.mubr.msk.f32.vlgmr.msra.gmra.mrb[2].mxu0 %vm264_vm3, %v570_v56 }
 0x4e1   :  { %v445_v57 = vpop.f32.mrb[2].mxu1 }
 0x4e2   :  { %v447_v59 = vpop.f32.mrb[3].mxu1 }
 0x4e5   :  { %v639_v61 = vpop.f32.mrb[2].mxu0 }
 0x4e6   :  { %v797_v0 = vadd.f32 %v639_v61, %v445_v57  ;;  %v641_v63 = vpop.f32.mrb[3].mxu0 }
 0x4e7   :  { %v798_v1 = vadd.f32 %v641_v63, %v447_v59 }
 0x4e8   :  { %v658_v2 = vadd.f32 %v797_v0, %v651_v60 }
 0x4e9   :  { %v659_v3 = vadd.f32 %v798_v1, %v655_v62 }
 0x4ea   :  { %660 = vst [vmem:[#allocation5] sm:$0xff] %v658_v2 }
 0x4eb   :  { %661 = vst [vmem:[#allocation5 + $0x8] sm:$0xff] %v659_v3 }
 0x4ec   :  { %858 = shalt.err (!%p855_p12)
}
 0x4ed   :  { %s859_s8 = scalar_lea.hbm %s1231_s7, 256 }
 0x4ee   :  { %p860_p13 = scmp.ne.s32.totalorder %s1231_s7, %s859_s8  ;;  %p863_p0 = scmp.lt.u32.totalorder %s859_s8, %s1231_s7 }
 0x4f0   :  { %p865_p1 = pnand %p863_p0, %p860_p13 }
 0x4f2   :  { %868 = shalt.err (!%p865_p1)
}
 0x4f3   :  { %671 = dma.vmem_to_hbm [thread:$0]  %s669_s28, 256, %s1231_s7, [#allocation4]  }
 0x4f4   :  { %871 = dma.done.wait [#allocation4], 256  }
 0x4f5   :  { %872 = vsyncadd [#allocation4], 4294967040 }
 0x4f6   :  { %675 = vsyncpa [#allocation3], 1 }
 0x4f7   :  { %676 = vsyncpa [#allocation4], 1 }

</bundles_post_ra>
